<compile_context>
chip_gen: v7x
topology: tpu7x:2x2x1
jax: 0.10.0
libtpu: 0.0.40
codegen_flags: <defaults>
</compile_context>

<pallas_src>
import math

import jax
import jax.numpy as jnp
from jax.experimental import pallas as pl
from jax.experimental.pallas import tpu as pltpu


def _mha_kernel(x_ref, wv_ref, wout_ref, bout_ref, o_ref):
    """Shapes seen inside the kernel:
         x_ref:    (bb, N, E)   tile of `bb` batch elements
         wv_ref:   (E, E)       V projection weight, transposed (x @ wv_ref = V)
         wout_ref: (E, E)       fc_out weight, transposed
         bout_ref: (1, E)       fc_out bias
         o_ref:    (bb, N, E)
    """
    x = x_ref[...].astype(jnp.float32)                       # (bb, N, E)

    # Per-batch-element sum over tokens (the only thing the output depends on).
    xsum = jnp.sum(x, axis=1)                                 # (bb, E)

    # V projection applied to the token sum (linear => order exchange is exact
    # up to float rounding), then the output projection. Both hit the MXU with
    # f32 accumulation; all heads are handled at once (heads are contiguous
    # columns of V, so no per-head loop / slicing / concatenation is needed).
    vsum = jnp.dot(xsum, wv_ref[...], preferred_element_type=jnp.float32)      # (bb, E)
    outvec = jnp.dot(vsum, wout_ref[...], preferred_element_type=jnp.float32)  # (bb, E)
    outvec = outvec + bout_ref[...]

    # Every token of a batch element gets the same row: broadcast store.
    o_ref[...] = jnp.broadcast_to(outvec[:, None, :], o_ref.shape).astype(o_ref.dtype)


def multi_head_attention_pallas(x, w_qkv, w_out, b_out, *, heads):
    """x: (B, N, E). w_qkv: (3E, E), w_out: (E, E), b_out: (E,). nn.Linear layout."""
    B, N, E = x.shape
    head_dim = E // heads
    assert head_dim * heads == E

    # Only the V slab of the qkv projection affects the output (see header note):
    # slice + transpose it in the wrapper so the kernel never slices qkv columns.
    wv_t = jnp.transpose(w_qkv[2 * E:3 * E, :])   # (E, E)
    wout_t = jnp.transpose(w_out)                 # (E, E)
    bout2d = b_out.reshape(1, E)                  # (1, E)

    # Batch-tile size: largest that fits a modest VMEM budget (x + out tiles,
    # double buffered), but keep >= 2 grid steps when possible so both v7x
    # TensorCores get work. Weights are grid-invariant resident blocks.
    itemsize = jnp.dtype(x.dtype).itemsize
    per_batch_vmem = N * E * itemsize * 2 * 2      # (x tile + out tile) * double-buffer
    vmem_budget = 8 * 1024 * 1024
    bb = max(1, min(B, vmem_budget // max(1, per_batch_vmem)))
    if B >= 2:
        bb = min(bb, max(1, B // 2))               # ensure grid length >= 2
    grid = (pl.cdiv(B, bb),)

    # Advisory cost: token-sum adds + two (B,E)x(E,E) GEMMs; bytes = x + out + weights.
    flops = int(B * N * E + 4 * B * E * E)
    bytes_accessed = int((2 * B * N * E + 2 * E * E + E) * itemsize)
    cost = pl.CostEstimate(flops=flops, transcendentals=0, bytes_accessed=bytes_accessed)

    return pl.pallas_call(
        _mha_kernel,
        out_shape=jax.ShapeDtypeStruct((B, N, E), x.dtype),
        grid_spec=pltpu.PrefetchScalarGridSpec(
            num_scalar_prefetch=0,
            grid=grid,
            in_specs=[
                pl.BlockSpec((bb, N, E), lambda i: (i, 0, 0)),   # x tile
                pl.BlockSpec((E, E), lambda i: (0, 0)),          # Wv^T   (resident)
                pl.BlockSpec((E, E), lambda i: (0, 0)),          # Wout^T (resident)
                pl.BlockSpec((1, E), lambda i: (0, 0)),          # bias   (resident)
            ],
            out_specs=pl.BlockSpec((bb, N, E), lambda i: (i, 0, 0)),
        ),
        compiler_params=pltpu.CompilerParams(
            dimension_semantics=("parallel",),
            vmem_limit_bytes=32 * 1024 * 1024,
        ),
        cost_estimate=cost,
    )(x, wv_t, wout_t, bout2d)


def multi_head_attention_ref(x, w_qkv, w_out, b_out, *, heads):
    """Literal pure-JAX mirror of the PyTorch forward (softmax path included)."""
    B, N, E = x.shape
    head_dim = E // heads
    scale = head_dim ** (-0.5)

    qkv = jnp.einsum('bne,fe->bnf', x, w_qkv)                 # (B, N, 3E)
    qkv = qkv.reshape(B, N, 3, heads, head_dim)
    qkv = jnp.transpose(qkv, (2, 0, 3, 1, 4))                 # (3, B, H, N, Dh)
    q, k, v = qkv[0], qkv[1], qkv[2]
    qk = jnp.einsum('bhqd,bhkd->bhqk', q, k)
    attn = jax.nn.softmax(qk / scale ** 0.5, axis=3)
    wa = jnp.einsum('bhqk,bhvd->bqhd', attn, v).reshape(B, N, E)
    return jnp.einsum('bne,fe->bnf', wa, w_out) + b_out


if __name__ == "__main__":
    # Small shapes consistent with the module's forward.
    B, N, E, H = 2, 8, 32, 4

    key = jax.random.PRNGKey(0)
    kx, kqkv, kw, kb = jax.random.split(key, 4)

    x = jax.random.normal(kx, (B, N, E), dtype=jnp.float32)

    # Deterministic parameter init (shapes per nn.Linear: (out_features, in_features)).
    bound = 1.0 / math.sqrt(E)
    w_qkv = jax.random.uniform(kqkv, (3 * E, E), jnp.float32, minval=-bound, maxval=bound)
    w_out = jax.random.uniform(kw, (E, E), jnp.float32, minval=-bound, maxval=bound)
    b_out = jax.random.uniform(kb, (E,), jnp.float32, minval=-bound, maxval=bound)

    out = multi_head_attention_pallas(x, w_qkv, w_out, b_out, heads=H)
    out = jax.block_until_ready(out)

    ref = multi_head_attention_ref(x, w_qkv, w_out, b_out, heads=H)
    assert out.shape == (B, N, E)
    assert jnp.allclose(out, ref, atol=1e-4, rtol=1e-4), "mismatch vs JAX reference"

    print("KERNEL_OK")
</pallas_src>

<mosaic_0001>
module attributes {stable_mosaic.version = 11 : i64} {
  func.func @_mha_kernel(%arg0: i32, %arg1: memref<1x8x32xf32, #tpu.memory_space<vmem>>, %arg2: memref<32x32xf32, #tpu.memory_space<vmem>>, %arg3: memref<32x32xf32, #tpu.memory_space<vmem>>, %arg4: memref<1x32xf32, #tpu.memory_space<vmem>>, %arg5: memref<1x8x32xf32, #tpu.memory_space<vmem>>) attributes {dimension_semantics = [#tpu.dimension_semantics<parallel>], iteration_bounds = array<i64: 2>, scalar_prefetch = 0 : i64, scratch_operands = 0 : i64, tpu.core_type = #tpu.core_type<tc>, window_params = [{transform_indices = @transform_0, window_bounds = array<i64: 1, 8, 32>}, {pipeline_mode = #tpu.pipeline_mode<synchronous>, transform_indices = @transform_1, window_bounds = array<i64: 32, 32>}, {pipeline_mode = #tpu.pipeline_mode<synchronous>, transform_indices = @transform_2, window_bounds = array<i64: 32, 32>}, {pipeline_mode = #tpu.pipeline_mode<synchronous>, transform_indices = @transform_3, window_bounds = array<i64: 1, 32>}, {transform_indices = @transform_4, window_bounds = array<i64: 1, 8, 32>}]} {
    %c0 = arith.constant 0 : index
    %c0_0 = arith.constant 0 : index
    %c0_1 = arith.constant 0 : index
    %0 = vector.load %arg1[%c0, %c0_0, %c0_1] : memref<1x8x32xf32, #tpu.memory_space<vmem>>, vector<1x8x32xf32>
    %cst = arith.constant dense<0.000000e+00> : vector<1x32xf32>
    %1 = vector.multi_reduction <add>, %0, %cst [1] : vector<1x8x32xf32> to vector<1x32xf32>
    %c0_2 = arith.constant 0 : index
    %c0_3 = arith.constant 0 : index
    %2 = vector.load %arg2[%c0_2, %c0_3] : memref<32x32xf32, #tpu.memory_space<vmem>>, vector<32x32xf32>
    %cst_4 = arith.constant dense<0.000000e+00> : vector<1x32xf32>
    %3 = tpu.matmul %1, %2, %cst_4 {dimension_numbers = #tpu.dot_dimension_numbers<[1], [0], [0], [1], [0, 0, 1, 1], [], []>} : vector<1x32xf32>, vector<32x32xf32>, vector<1x32xf32> -> vector<1x32xf32>
    %c0_5 = arith.constant 0 : index
    %c0_6 = arith.constant 0 : index
    %4 = vector.load %arg3[%c0_5, %c0_6] : memref<32x32xf32, #tpu.memory_space<vmem>>, vector<32x32xf32>
    %cst_7 = arith.constant dense<0.000000e+00> : vector<1x32xf32>
    %5 = tpu.matmul %3, %4, %cst_7 {dimension_numbers = #tpu.dot_dimension_numbers<[1], [0], [0], [1], [0, 0, 1, 1], [], []>} : vector<1x32xf32>, vector<32x32xf32>, vector<1x32xf32> -> vector<1x32xf32>
    %c0_8 = arith.constant 0 : index
    %c0_9 = arith.constant 0 : index
    %6 = vector.load %arg4[%c0_8, %c0_9] : memref<1x32xf32, #tpu.memory_space<vmem>>, vector<1x32xf32>
    %7 = arith.addf %5, %6 : vector<1x32xf32>
    %8 = vector.shape_cast %7 : vector<1x32xf32> to vector<1x1x32xf32>
    %9 = vector.shape_cast %8 : vector<1x1x32xf32> to vector<1x1x32xf32>
    %10 = vector.broadcast %9 : vector<1x1x32xf32> to vector<1x8x32xf32>
    %c0_10 = arith.constant 0 : index
    %c0_11 = arith.constant 0 : index
    %c0_12 = arith.constant 0 : index
    %11 = vector.load %arg5[%c0_10, %c0_11, %c0_12] : memref<1x8x32xf32, #tpu.memory_space<vmem>>, vector<1x8x32xf32>
    tpu.vector_store %arg5[%c0_10, %c0_11, %c0_12], %10 {strides = array<i32>} : memref<1x8x32xf32, #tpu.memory_space<vmem>>, vector<1x8x32xf32>,
    return
  }
  func.func @transform_0(%arg0: i32) -> (i32, i32, i32) {
    %c0_i32 = arith.constant 0 : i32
    %c0_i32_0 = arith.constant 0 : i32
    %c0_i32_1 = arith.constant 0 : i32
    return %arg0, %c0_i32, %c0_i32_0 : i32, i32, i32
  }
  func.func @transform_1(%arg0: i32) -> (i32, i32) {
    %c0_i32 = arith.constant 0 : i32
    %c0_i32_0 = arith.constant 0 : i32
    %c0_i32_1 = arith.constant 0 : i32
    return %c0_i32, %c0_i32_0 : i32, i32
  }
  func.func @transform_2(%arg0: i32) -> (i32, i32) {
    %c0_i32 = arith.constant 0 : i32
    %c0_i32_0 = arith.constant 0 : i32
    %c0_i32_1 = arith.constant 0 : i32
    return %c0_i32, %c0_i32_0 : i32, i32
  }
  func.func @transform_3(%arg0: i32) -> (i32, i32) {
    %c0_i32 = arith.constant 0 : i32
    %c0_i32_0 = arith.constant 0 : i32
    %c0_i32_1 = arith.constant 0 : i32
    return %c0_i32, %c0_i32_0 : i32, i32
  }
  func.func @transform_4(%arg0: i32) -> (i32, i32, i32) {
    %c0_i32 = arith.constant 0 : i32
    %c0_i32_0 = arith.constant 0 : i32
    %c0_i32_1 = arith.constant 0 : i32
    return %arg0, %c0_i32, %c0_i32_0 : i32, i32, i32
  }
}

</mosaic_0001>

<bundles_post_ra>
// kernel: tpu_custom_call.1
= control target key start
LH: loop header
LB: loop body
LE: loop exit
PB: predicated region body
PF: predicated region fallthrough
CT: control target
= control target key end

     0   :  { %9 = vsyncpa [#allocation3], 0  ;;  %s1080_s0 = inlined_call_operand.hbm [shape: f32[2,8,32], index: 0, kind: input, shape index: {}]   ;;  %s1081_s1 = inlined_call_operand.hbm [shape: f32[32,32], index: 1, kind: input, shape index: {}]   ;;  %s1082_s2 = inlined_call_operand.hbm [shape: f32[32,32], index: 2, kind: input, shape index: {}]   ;;  %s1083_s3 = inlined_call_operand.vmem [shape: f32[1,32], index: 3, kind: input, shape index: {}]   ;;  %s1084_s4 = inlined_call_operand.hbm [shape: f32[2,8,32], index: 4, kind: output, shape index: {}]  }
   0x1   :  { %11 = vsyncpa [#allocation3 + $0x1], 0 }
   0x2   :  { %12 = vsyncpa [#allocation6], 0 }
   0x3   :  { %13 = vsyncpa [#allocation4], 0 }
   0x4   :  { %15 = vsyncpa [#allocation4 + $0x1], 0  ;;  %s840_s15 = smov 0   ;;  %s842_s16 = smov 0  }
   0x5   :  { %s844_s17 = smov 0   ;;  %s846_s18 = smov 0  }
   0x6 LB: > { %s861_s19 = sadd.s32 4294967295, %s804_s18   ;;  %s514_s20 = sadd.s32 4294967294, %s804_s18   ;;  %s804_s18 = sphi %s846_s18, %s1104_s18   ;;  %s800_s17 = sphi %s844_s17, %s1103_s17   ;;  %s796_s16 = sphi %s842_s16, %s1102_s16   ;;  %s792_s15 = sphi %s840_s15, %s1101_s15  }
   0x7   : > { %p41_p0 = scmp.ne.s32.totalorder %s796_s16, %s792_s15  ;;  %p1085_p1 = scmp.eq.s32.totalorder %s861_s19, 0 }
   0x8   : > { %p134_p3 = scmp.eq.s32.totalorder %s514_s20, 1  ;;  %p515_p5 = scmp.ge.s32.totalorder %s804_s18, 1 }
   0x9   : > { %p870_p4 = por %p1085_p1, %p41_p0  ;;  %p141_p7 = scmp.lt.s32.totalorder %s804_s18, 3 }
   0xa   : > { %p875_p6 = por %p134_p3, %p41_p0  ;;  %s806_s24 = smov [#allocation5]  }
   0xb   : > { %s1088_s21 = scalar_select %p870_p4, 1, 0 }
   0xc   : > { %s1089_s22 = scalar_select %p875_p6, 1, 0 }
   0xd   : > { %p880_p8 = pnand %p515_p5, %p141_p7  ;;  %s153_s25 = sshll.u32 %s806_s24, 4  ;;  %s884_s25 = int_to_ptr.vmem [resolvable:$true] %s153_s25 }
   0xe   : > { %s807_s27 = smov [#allocation7]   ;;  %s648_s5 = scalar_lea.hbm %s1081_s1, 512 }
   0xf   : > { %p588_p9 = pneg %p880_p8  ;;  %s166_s28 = sshll.u32 %s807_s27, 4  ;;  %s895_s28 = int_to_ptr.vmem [resolvable:$true] %s166_s28 }
  0x10   : > { %p649_p12 = scmp.ne.s32.totalorder %s1081_s1, %s648_s5  ;;  %p655_p5 = scmp.lt.u32.totalorder %s648_s5, %s1081_s1 }
  0x11   : > { %p891_p11 = pnand %p588_p9, %p1085_p1 }
  0x13   : > { %p650_p13 = pneg %p891_p11 }
  0x15   : > { %p651_p0 = pnand %p650_p13, %p649_p12 }
  0x17   : > { %p652_p3 = pneg %p651_p0 }
  0x19   : > { %p657_p7 = pnand %p655_p5, %p652_p3 }
  0x1b   : > { %660 = shalt.err (!%p657_p7)
}
  0x1c   : > { %s661_s10 = scalar_lea.vmem %s884_s25, 512  ;;  %p669_p2 = scmp.lt.s32.totalorder %s884_s25, %s884_s25 }
  0x1d   : > { %p662_p9 = scmp.ne.s32.totalorder %s884_s25, %s661_s10  ;;  %p670_p12 = scmp.lt.s32.totalorder %s661_s10, %s661_s10 }
  0x1f   : > { %p664_p10 = pnand %p662_p9, %p650_p13  ;;  %p671_p0 = por %p670_p12, %p669_p2 }
  0x21   : > { %p665_p1 = pneg %p664_p10 }
  0x23   : > { %p672_p6 = pnand %p671_p0, %p665_p1 }
  0x25   : > { %675 = shalt.err (!%p672_p6)
}
  0x26   : > { %s808_s11 = smov 128   ;;  %s809_s12 = smov 8  }
  0x27   : > { %591 = dma.hbm_to_vmem [thread:$0]  (!%p891_p11), %s1081_s1, 512, %s884_s25, [#allocation6], %s808_s11, %s808_s11, %s809_s12  }
  0x28   : > { %s676_s27 = scalar_lea.hbm %s1082_s2, 512 }
  0x29   : > { %p677_p2 = scmp.ne.s32.totalorder %s1082_s2, %s676_s27  ;;  %p683_p10 = scmp.lt.u32.totalorder %s676_s27, %s1082_s2 }
  0x2b   : > { %p679_p1 = pnand %p677_p2, %p650_p13 }
  0x2d   : > { %p680_p6 = pneg %p679_p1 }
  0x2f   : > { %p685_p3 = pnand %p683_p10, %p680_p6 }
  0x31   : > { %688 = shalt.err (!%p685_p3)
}
  0x32   : > { %s689_s25 = scalar_lea.vmem %s895_s28, 512  ;;  %p697_p12 = scmp.lt.s32.totalorder %s895_s28, %s895_s28 }
  0x33   : > { %p690_p5 = scmp.ne.s32.totalorder %s895_s28, %s689_s25  ;;  %p698_p0 = scmp.lt.s32.totalorder %s689_s25, %s689_s25 }
  0x35   : > { %p692_p7 = pnand %p690_p5, %p650_p13  ;;  %p699_p2 = por %p698_p0, %p697_p12 }
  0x37   : > { %p693_p9 = pneg %p692_p7 }
  0x39   : > { %p700_p1 = pnand %p699_p2, %p693_p9 }
  0x3b   : > { %703 = shalt.err (!%p700_p1)
}
  0x3c   : > { %594 = dma.hbm_to_vmem [thread:$0]  (!%p891_p11), %s1082_s2, 512, %s895_s28, [#allocation6], %s808_s11, %s808_s11, %s809_s12  }
  0x3d   : > { %s950_s9 = sadd.s32 1, %s804_s18   ;;  %s28_s26 = sadd.s32 1, %s800_s17 }
  0x3e   : > { %s25_s10 = ssub.s32 %s804_s18, %s950_s9  ;;  %p35_p13 = scmp.ne.s32.totalorder %s800_s17, %s796_s16 }
  0x3f   : > { %p26_p6 = scmp.eq.s32.totalorder %s25_s10, 0  ;;  %p36_p10 = scmp.eq.s32.totalorder %s804_s18, 0 }
  0x40   : > { %p1092_p3 = scmp.eq.s32.totalorder %s861_s19, 1  ;;  %p605_p7 = scmp.lt.s32.totalorder %s804_s18, 2 }
  0x41   : > { %s966_s14 = scalar_select %p26_p6, %s800_s17, %s28_s26  }
  0x42   : > { %p960_p5 = por %p1092_p3, %p35_p13  ;;  %p37_p9 = por %p36_p10, %p35_p13 }
  0x43   : > { %s183_s20 = sand.u32 1, %s800_s17   ;;  %s520_s28 = sshll.u32 %s804_s18, 7 }
  0x44   : > { %s1093_s13 = scalar_select %p960_p5, 1, 0 }
  0x45   : > { %s519_s24 = sshll.u32 %s183_s20, 3  ;;  %s973_s27 = scalar_lea.hbm %s1080_s0, %s520_s28 }
  0x46   : > { %s187_s29 = scalar_lea.vmem [#allocation2], %s519_s24  ;;  %p977_p11 = pnand %p605_p7, %p37_p9 }
  0x47   : > { %s194_s30 = sshll.u32 %s187_s29, 4  ;;  %s184_s6 = scalar_lea.sflag [#allocation3], %s183_s20  ;;  %s975_s30 = int_to_ptr.vmem [resolvable:$true] %s194_s30 }
  0x48   : > { %s704_s25 = scalar_lea.hbm %s973_s27, 128  ;;  %p706_p0 = pneg %p977_p11 }
  0x49   : > { %p705_p12 = scmp.ne.s32.totalorder %s973_s27, %s704_s25  ;;  %s709_s26 = scalar_lea.hbm %s1080_s0, 256 }
  0x4a   : > { %p710_p13 = scmp.lt.u32.totalorder %s973_s27, %s1080_s0  ;;  %p711_p6 = scmp.lt.u32.totalorder %s709_s26, %s704_s25 }
  0x4b   : > { %p707_p2 = pnand %p706_p0, %p705_p12  ;;  %p713_p3 = scmp.lt.u32.totalorder %s704_s25, %s973_s27 }
  0x4c   : > { %p712_p10 = por %p711_p6, %p710_p13 }
  0x4d   : > { %p708_p1 = pneg %p707_p2 }
  0x4e   : > { %p714_p7 = por %p713_p3, %p712_p10 }
  0x50   : > { %p715_p9 = pnand %p714_p7, %p708_p1 }
  0x52   : > { %718 = shalt.err (!%p715_p9)
}
  0x53   : > { %s719_s20 = scalar_lea.vmem %s975_s30, 128  ;;  %s810_s28 = smov [#allocation2]  }
  0x54   : > { %p720_p12 = scmp.ne.s32.totalorder %s975_s30, %s719_s20  ;;  %s724_s11 = sshll.u32 %s810_s28, 4  ;;  %s725_s11 = int_to_ptr.vmem [resolvable:$false] %s724_s11 }
  0x55   : > { %s726_s12 = scalar_lea.vmem %s725_s11, 256  ;;  %p727_p4 = scmp.lt.s32.totalorder %s975_s30, %s725_s11 }
  0x56   : > { %p722_p2 = pnand %p720_p12, %p706_p0  ;;  %p728_p13 = scmp.lt.s32.totalorder %s726_s12, %s719_s20 }
  0x58   : > { %p723_p5 = pneg %p722_p2  ;;  %p729_p6 = por %p728_p13, %p727_p4 }
  0x5a   : > { %p730_p10 = pnand %p729_p6, %p723_p5 }
  0x5c   : > { %733 = shalt.err (!%p730_p10)
}
  0x5d   : > { %598 = dma.hbm_to_vmem [thread:$0]  (!%p977_p11), %s973_s27, 128, %s975_s30, %s184_s6  }
  0x5e   : > { %203 = sbr.rel (%p880_p8) target bundleno = 563 (0x233), region = 36  ;;  %s1009_s29 = sand.u32 (!%p880_p8), 1, %s796_s16  }
  0x5f   : > { %s522_s25 = sshll.u32 (!%p880_p8), %s1009_s29, 3  ;;  %s206_s7 = scalar_lea.sflag (!%p880_p8), [#allocation3], %s1009_s29 }
  0x60   : > { %s209_s8 = scalar_lea.vmem (!%p880_p8), [#allocation2], %s522_s25  ;;  %p1095_p4 = scmp.ne.s32.totalorder (!%p880_p8), %s1088_s21, 0 }
  0x65   : > { %779 = dma.done.wait (%p1095_p4), %s206_s7, 128  }
  0x66   : > { %781 = vsyncadd (%p1095_p4), %s206_s7, 4294967168  ;;  %p1096_p5 = scmp.eq.s32.totalorder %s861_s19, 0 }
  0x68   : > { %783 = dma.done.wait (%p1096_p5), [#allocation6], 1024   ;;  %p1097_p8 = pmov %p1096_p5 }
  0x69   : > { %v811_v0 = vmov 0.0|0.0   ;;  %vm812_vm0 = vmmov 0   ;;  %v813_v1 = vmov 0.0   ;;  %vm243_vm1 = vcmask 261120   ;;  %v251_v2 = vld [vmem:[#allocation5] sm:$0xff]  ;;  %v252_v3 = vld [vmem:[#allocation5 + $0x8] sm:$0xff] }
  0x6a   : > { %785 = vsyncadd (%p1097_p8), [#allocation6], 4294966272  ;;  %564 = vmatprep.subr.bf16.mxu0 %v811_v0  ;;  %550 = vmatprep.mubr.msk.f32.mxu0 %vm812_vm0, %v813_v1  ;;  %v253_v4 = vld [vmem:[#allocation5 + $0x10] sm:$0xff]  ;;  %v565_v5 = vpack.c.bf16 %v252_v3, %v251_v2  ;;  %v254_v6 = vld [vmem:[#allocation5 + $0x18] sm:$0xff]  ;;  %v406_v24 = vlaneseq  ;;  %s529_s27 = sshll.u32 %s861_s19, 7  ;;  %s241_s30 = scalar_lea.vmem [#allocation8], %s522_s25 }
  0x6b   : > { %570 = vmatprep.subr.bf16.mxu1 %v811_v0  ;;  %561 = vmatprep.mubr.msk.f32.mxu1 %vm812_vm0, %v813_v1  ;;  %v242_v7 = vld [vmem:[%s209_s8] sm:$0xff]  ;;  %v328_v8 = vld [vmem:[#allocation7] sm:$0xff]  ;;  %v329_v10 = vld [vmem:[#allocation7 + $0x8] sm:$0xff]  ;;  %v568_v13 = vpack.c.bf16 %v254_v6, %v253_v4  ;;  %s425_s5 = sshll.u32 %s241_s30, 4  ;;  %s1035_s10 = scalar_lea.hbm %s1084_s4, %s529_s27  ;;  %s1037_s5 = int_to_ptr.vmem [resolvable:$true] %s425_s5 }
  0x6c   : > { %v244_v9 = vsel %vm243_vm1, %v242_v7, 0.0  ;;  %v330_v11 = vld [vmem:[#allocation7 + $0x10] sm:$0xff]  ;;  %v331_v12 = vld [vmem:[#allocation7 + $0x18] sm:$0xff]  ;;  %566 = vmatpush3.bf16.msra.mxu0 %v565_v5  ;;  %v571_v15 = vpack.c.bf16 %v329_v10, %v328_v8  ;;  %v407_v25 = vshrl.u32 %v406_v24, 7  ;;  %s412_s24 = scalar_lea.sflag [#allocation4], %s1009_s29  ;;  %s734_s19 = scalar_lea.vmem %s1037_s5, 128 }
  0x6d   : > { %v245_v14 = vrot.slane %v244_v9, 4  ;;  %567 = vmatprep.subr.bf16.mxu0 %v811_v0  ;;  %v574_v17 = vpack.c.bf16 %v331_v12, %v330_v11  ;;  %v332_v26 = vld [vmem:[%s1083_s3] sm:$0x1]  ;;  %p735_p11 = scmp.ne.s32.totalorder %s1037_s5, %s734_s19  ;;  %p1098_p0 = scmp.ne.s32.totalorder %s1093_s13, 0 }
  0x6e   : > { %572 = vmatpush3.bf16.msra.mxu1 %v571_v15  ;;  %v408_v27 = vsub.s32 0, %v407_v25  ;;  %s814_s20 = smov [#allocation8]  }
  0x6f   : > { %v246_v16 = vadd.f32 %v245_v14, %v244_v9  ;;  %573 = vmatprep.subr.bf16.mxu1 %v811_v0  ;;  %p736_p1 = pnand %p735_p11, %p1098_p0  ;;  %s738_s28 = sshll.u32 %s814_s20, 4  ;;  %s739_s28 = int_to_ptr.vmem [resolvable:$false] %s738_s28 }
  0x70   : > { %569 = vmatpush3.bf16.msra.mxu0 %v568_v13  ;;  %s740_s11 = scalar_lea.vmem %s739_s28, 256  ;;  %p741_p7 = scmp.lt.s32.totalorder %s1037_s5, %s739_s28 }
  0x71   : > { %v247_v18 = vrot.slane %v246_v16, 2  ;;  %p737_p3 = pneg %p736_p1  ;;  %p742_p9 = scmp.lt.s32.totalorder %s740_s11, %s734_s19 }
  0x72   : > { %575 = vmatpush3.bf16.msra.mxu1 %v574_v17 }
  0x73   : > { %v248_v19 = vadd.f32 %v247_v18, %v246_v16  ;;  %p743_p12 = por %p742_p9, %p741_p7 }
  0x75   : > { %v249_v20 = vrot.slane %v248_v19, 1  ;;  %p744_p2 = pnand %p743_p12, %p737_p3 }
  0x77   : > { %v250_v21 = vadd.f32 %v249_v20, %v248_v19 }
  0x79   : > { %551 = vmatmul.mubr.msk.f32.vlgmr.msra.gmra.mrb[0].mxu0 %vm243_vm1, %v250_v21 }
 0x14c   : > { %v324_v22 = vpop.f32.mrb[0].mxu0 }
 0x14d   : > { %v552_v23 = vpop.f32.mrb[1].mxu0  ;;  %562 = vmatmul.mubr.msk.f32.vlgmr.msra.gmra.mrb[0].mxu1 %vm243_vm1, %v324_v22 }
 0x220   : > { %v402_v28 = vpop.f32.mrb[0].mxu1 }
 0x221   : > { %v403_v29 = vadd.f32 %v402_v28, %v332_v26  ;;  %v563_v30 = vpop.f32.mrb[1].mxu1 }
 0x223   : > { %v409_v31 = vrot.slane %v403_v29, %v408_v27 }
 0x225   : > { %410 = vst.msk [vmem:[%s241_s30] sm:$0xff] %vm243_vm1, %v409_v31 }
 0x226   : > { %747 = shalt.err (!%p744_p2)
}
 0x227   : > { %s748_s12 = scalar_lea.hbm %s1035_s10, 128  ;;  %s752_s7 = scalar_lea.hbm %s1084_s4, 256 }
 0x228   : > { %p749_p13 = scmp.ne.s32.totalorder %s1035_s10, %s748_s12  ;;  %p753_p4 = scmp.lt.u32.totalorder %s1035_s10, %s1084_s4 }
 0x229   : > { %p754_p5 = scmp.lt.u32.totalorder %s752_s7, %s748_s12  ;;  %p756_p11 = scmp.lt.u32.totalorder %s748_s12, %s1035_s10 }
 0x22a   : > { %p750_p6 = pnand %p749_p13, %p1098_p0 }
 0x22b   : > { %p755_p8 = por %p754_p5, %p753_p4 }
 0x22c   : > { %p751_p10 = pneg %p750_p6 }
 0x22d   : > { %p757_p1 = por %p756_p11, %p755_p8 }
 0x22f   : > { %p758_p3 = pnand %p757_p1, %p751_p10 }
 0x231   : > { %761 = shalt.err (!%p758_p3)
}
 0x232   : > { %586 = dma.vmem_to_hbm [thread:$0]  (%p1098_p0), %s1037_s5, 128, %s1035_s10, %s412_s24  }
 0x233 PF: > { %s437_s23 = sand.u32 1, %s792_s15   ;;  %p1099_p7 = scmp.ne.s32.totalorder %s1089_s22, 0 }
 0x234   : > { %p1100_p9 = scmp.ge.s32.totalorder %s804_s18, 2  ;;  %s438_s27 = scalar_lea.sflag [#allocation4], %s437_s23 }
 0x236   : > { %p600_p12 = pnand %p1100_p9, %p1099_p7 }
 0x238   : > { %787 = dma.done.wait (!%p600_p12), %s438_s27, 128  }
 0x239   : > { %789 = vsyncadd (!%p600_p12), %s438_s27, 4294967168  ;;  %p18_p2 = scmp.ge.s32.totalorder %s950_s9, 4   ;;  %s1101_s15 = smov %s796_s16 }
 0x23a   : > { %s1102_s16 = smov %s800_s17  ;;  %s1103_s17 = smov %s966_s14 }
 0x23b   : > { %s1104_s18 = smov %s950_s9  ;;  %20 = sbr.rel (!%p18_p2) target bundleno = 6 (0x6), region = 89 }
 0x242   :  { %443 = vsyncpa [#allocation3], 1 }
 0x243   :  { %445 = vsyncpa [#allocation3 + $0x1], 1 }
 0x244   :  { %446 = vsyncpa [#allocation6], 1 }
 0x245   :  { %447 = vsyncpa [#allocation4], 1 }
 0x246   :  { %449 = vsyncpa [#allocation4 + $0x1], 1 }

</bundles_post_ra>
